<compile_context>
chip_gen: v5e
topology: v5e:2x2
jax: 0.10.0
libtpu: 0.0.40
codegen_flags: <defaults>
</compile_context>

<pallas_src>
import jax
import jax.numpy as jnp
from jax.experimental import pallas as pl
from jax.experimental.pallas import tpu as pltpu

# ---- small config consistent with the module ----
B = 8          # batch
IN_C = 32      # input_channel
HID_C = 64     # hidden_channel
OUT_C = 16     # output_channel
PAD = 128      # lane-dense padded width for weights / output

# Packed-slab row layout (all offsets 8/16-sublane aligned).
R_W1 = 0                     # rows  0..31  : w1  (IN_C  x PAD)
R_W2 = IN_C                  # rows 32..95  : w2  (HID_C x PAD)
R_W3 = IN_C + HID_C          # rows 96..159 : w3  (HID_C x PAD)
R_B = IN_C + 2 * HID_C       # rows 160..162: b1 / b2 / b3
N_ROWS = 176                 # padded to a multiple of 16 (bf16 sublane packing)


def mlp_kernel(x_ref, w_ref, o_ref):
    x = x_ref[...].astype(jnp.bfloat16)                 # (B, IN_C)
    w1 = w_ref[R_W1:R_W1 + IN_C, :]                     # (IN_C,  PAD) bf16
    w2 = w_ref[R_W2:R_W2 + HID_C, :]                    # (HID_C, PAD) bf16
    w3 = w_ref[R_W3:R_W3 + HID_C, :]                    # (HID_C, PAD) bf16
    b = w_ref[R_B:R_B + 3, :].astype(jnp.float32)       # (3, PAD)

    h = jnp.dot(x, w1, preferred_element_type=jnp.float32) + b[0:1, :]
    h = jnp.maximum(h, 0.0)
    h = jnp.dot(h[:, :HID_C].astype(jnp.bfloat16), w2,
                preferred_element_type=jnp.float32) + b[1:2, :]
    h = jnp.maximum(h, 0.0)
    o_ref[...] = jnp.dot(h[:, :HID_C].astype(jnp.bfloat16), w3,
                         preferred_element_type=jnp.float32) + b[2:3, :]


def pack_params(params):
    """Init-time (call once): pack all weights + biases into one bf16 slab."""
    w1, b1, w2, b2, w3, b3 = params
    slab = jnp.zeros((N_ROWS, PAD), jnp.float32)
    slab = slab.at[R_W1:R_W1 + IN_C, :HID_C].set(w1)
    slab = slab.at[R_W2:R_W2 + HID_C, :HID_C].set(w2)
    slab = slab.at[R_W3:R_W3 + HID_C, :OUT_C].set(w3)
    slab = slab.at[R_B + 0, :HID_C].set(b1)
    slab = slab.at[R_B + 1, :HID_C].set(b2)
    slab = slab.at[R_B + 2, :OUT_C].set(b3)
    return slab.astype(jnp.bfloat16)


@jax.jit
def embedding_classifier(x, w_slab):
    """x: (B, IN_C) f32, w_slab: pre-packed (N_ROWS, PAD) bf16.
    Returns (B, OUT_C) f32 (same semantics as module.forward — no softmax)."""
    batch = x.shape[0]
    out_padded = pl.pallas_call(
        mlp_kernel,
        out_shape=jax.ShapeDtypeStruct((batch, PAD), jnp.float32),
        grid_spec=pltpu.PrefetchScalarGridSpec(
            num_scalar_prefetch=0,
            grid=(1,),
            in_specs=[
                pl.BlockSpec((batch, IN_C), lambda i: (0, 0)),   # activations
                pl.BlockSpec((N_ROWS, PAD), lambda i: (0, 0)),   # packed params
            ],
            out_specs=pl.BlockSpec((batch, PAD), lambda i: (0, 0)),
        ),
        compiler_params=pltpu.CompilerParams(
            dimension_semantics=("arbitrary",)),
    )(x, w_slab)
    # Slice stays inside the same jit -> single dispatch per forward.
    return out_padded[:, :OUT_C]


# ---------- pure-JAX references (for verification) ----------
def embedding_classifier_ref_bf16(x, params):
    """Matches the kernel's bf16-input / f32-accumulate numerics."""
    w1, b1, w2, b2, w3, b3 = params
    bf = lambda a: a.astype(jnp.bfloat16)
    h = jnp.dot(bf(x), bf(w1), preferred_element_type=jnp.float32) \
        + bf(b1).astype(jnp.float32)
    h = jnp.maximum(h, 0.0)
    h = jnp.dot(bf(h), bf(w2), preferred_element_type=jnp.float32) \
        + bf(b2).astype(jnp.float32)
    h = jnp.maximum(h, 0.0)
    return jnp.dot(bf(h), bf(w3), preferred_element_type=jnp.float32) \
        + bf(b3).astype(jnp.float32)


def embedding_classifier_ref_f32(x, params):
    w1, b1, w2, b2, w3, b3 = params
    h = jnp.maximum(x @ w1 + b1, 0.0)
    h = jnp.maximum(h @ w2 + b2, 0.0)
    return h @ w3 + b3


if __name__ == "__main__":
    key = jax.random.PRNGKey(0)
    ks = jax.random.split(key, 8)

    def init(k, shape, scale=0.1):
        return (jax.random.normal(k, shape, jnp.float32) * scale).astype(jnp.float32)

    w1, b1 = init(ks[0], (IN_C, HID_C)), init(ks[1], (HID_C,))
    w2, b2 = init(ks[2], (HID_C, HID_C)), init(ks[3], (HID_C,))
    w3, b3 = init(ks[4], (HID_C, OUT_C)), init(ks[5], (OUT_C,))
    params = (w1, b1, w2, b2, w3, b3)

    x = jax.random.normal(ks[6], (B, IN_C), jnp.float32)

    # Pack parameters ONCE at init; only (x, w_slab) flow through per call.
    w_slab = pack_params(params)
    jax.block_until_ready(w_slab)

    out = embedding_classifier(x, w_slab)
    jax.block_until_ready(out)

    assert out.shape == (B, OUT_C)
    # Tight check vs. a reference using the same bf16-weight numerics.
    ref_bf16 = embedding_classifier_ref_bf16(x, params)
    assert jnp.allclose(out, ref_bf16, atol=1e-3, rtol=1e-3), \
        "mismatch vs bf16-matched JAX reference"
    # Loose sanity check vs. the full-f32 reference (bf16 weights => small drift).
    ref_f32 = embedding_classifier_ref_f32(x, params)
    assert jnp.allclose(out, ref_f32, atol=5e-2, rtol=5e-2), \
        "mismatch vs f32 JAX reference"

    print("KERNEL_OK")
</pallas_src>

<mosaic_0001>
module attributes {stable_mosaic.version = 11 : i64} {
  func.func @mlp_kernel(%arg0: i32, %arg1: memref<8x32xf32, #tpu.memory_space<vmem>>, %arg2: memref<176x128xbf16, #tpu.memory_space<vmem>>, %arg3: memref<8x128xf32, #tpu.memory_space<vmem>>) attributes {dimension_semantics = [#tpu.dimension_semantics<arbitrary>], iteration_bounds = array<i64: 1>, scalar_prefetch = 0 : i64, scratch_operands = 0 : i64, tpu.core_type = #tpu.core_type<tc>, window_params = [{pipeline_mode = #tpu.pipeline_mode<synchronous>, transform_indices = @transform_0, window_bounds = array<i64: 8, 32>}, {pipeline_mode = #tpu.pipeline_mode<synchronous>, transform_indices = @transform_1, window_bounds = array<i64: 176, 128>}, {pipeline_mode = #tpu.pipeline_mode<synchronous>, transform_indices = @transform_2, window_bounds = array<i64: 8, 128>}]} {
    %c0 = arith.constant 0 : index
    %c0_0 = arith.constant 0 : index
    %0 = vector.load %arg1[%c0, %c0_0] : memref<8x32xf32, #tpu.memory_space<vmem>>, vector<8x32xf32>
    %1 = arith.truncf %0 : vector<8x32xf32> to vector<8x32xbf16>
    %c0_1 = arith.constant 0 : index
    %c0_2 = arith.constant 0 : index
    %2 = vector.load %arg2[%c0_1, %c0_2] : memref<176x128xbf16, #tpu.memory_space<vmem>>, vector<32x128xbf16>
    %c32 = arith.constant 32 : index
    %c0_3 = arith.constant 0 : index
    %3 = vector.load %arg2[%c32, %c0_3] : memref<176x128xbf16, #tpu.memory_space<vmem>>, vector<64x128xbf16>
    %c96 = arith.constant 96 : index
    %c0_4 = arith.constant 0 : index
    %4 = vector.load %arg2[%c96, %c0_4] : memref<176x128xbf16, #tpu.memory_space<vmem>>, vector<64x128xbf16>
    %c160 = arith.constant 160 : index
    %c0_5 = arith.constant 0 : index
    %5 = vector.load %arg2[%c160, %c0_5] : memref<176x128xbf16, #tpu.memory_space<vmem>>, vector<3x128xbf16>
    %6 = arith.extf %5 : vector<3x128xbf16> to vector<3x128xf32>
    %cst = arith.constant dense<0.000000e+00> : vector<8x128xf32>
    %7 = tpu.matmul %1, %2, %cst {dimension_numbers = #tpu.dot_dimension_numbers<[1], [0], [0], [1], [0, 0, 1, 1], [], []>} : vector<8x32xbf16>, vector<32x128xbf16>, vector<8x128xf32> -> vector<8x128xf32>
    %8 = vector.extract_strided_slice %6 {offsets = [0, 0], sizes = [1, 128], strides = [1, 1]} : vector<3x128xf32> to vector<1x128xf32>
    %9 = vector.broadcast %8 : vector<1x128xf32> to vector<8x128xf32>
    %10 = arith.addf %7, %9 : vector<8x128xf32>
    %cst_6 = arith.constant 0.000000e+00 : f32
    %11 = vector.broadcast %cst_6 : f32 to vector<8x128xf32>
    %12 = arith.maximumf %10, %11 : vector<8x128xf32>
    %13 = vector.extract_strided_slice %12 {offsets = [0, 0], sizes = [8, 64], strides = [1, 1]} : vector<8x128xf32> to vector<8x64xf32>
    %14 = arith.truncf %13 : vector<8x64xf32> to vector<8x64xbf16>
    %cst_7 = arith.constant dense<0.000000e+00> : vector<8x128xf32>
    %15 = tpu.matmul %14, %3, %cst_7 {dimension_numbers = #tpu.dot_dimension_numbers<[1], [0], [0], [1], [0, 0, 1, 1], [], []>} : vector<8x64xbf16>, vector<64x128xbf16>, vector<8x128xf32> -> vector<8x128xf32>
    %16 = vector.extract_strided_slice %6 {offsets = [1, 0], sizes = [1, 128], strides = [1, 1]} : vector<3x128xf32> to vector<1x128xf32>
    %17 = vector.broadcast %16 : vector<1x128xf32> to vector<8x128xf32>
    %18 = arith.addf %15, %17 : vector<8x128xf32>
    %cst_8 = arith.constant 0.000000e+00 : f32
    %19 = vector.broadcast %cst_8 : f32 to vector<8x128xf32>
    %20 = arith.maximumf %18, %19 : vector<8x128xf32>
    %21 = vector.extract_strided_slice %20 {offsets = [0, 0], sizes = [8, 64], strides = [1, 1]} : vector<8x128xf32> to vector<8x64xf32>
    %22 = arith.truncf %21 : vector<8x64xf32> to vector<8x64xbf16>
    %cst_9 = arith.constant dense<0.000000e+00> : vector<8x128xf32>
    %23 = tpu.matmul %22, %4, %cst_9 {dimension_numbers = #tpu.dot_dimension_numbers<[1], [0], [0], [1], [0, 0, 1, 1], [], []>} : vector<8x64xbf16>, vector<64x128xbf16>, vector<8x128xf32> -> vector<8x128xf32>
    %24 = vector.extract_strided_slice %6 {offsets = [2, 0], sizes = [1, 128], strides = [1, 1]} : vector<3x128xf32> to vector<1x128xf32>
    %25 = vector.broadcast %24 : vector<1x128xf32> to vector<8x128xf32>
    %26 = arith.addf %23, %25 : vector<8x128xf32>
    %c0_10 = arith.constant 0 : index
    %c0_11 = arith.constant 0 : index
    %27 = vector.load %arg3[%c0_10, %c0_11] : memref<8x128xf32, #tpu.memory_space<vmem>>, vector<8x128xf32>
    tpu.vector_store %arg3[%c0_10, %c0_11], %26 {strides = array<i32>} : memref<8x128xf32, #tpu.memory_space<vmem>>, vector<8x128xf32>,
    return
  }
  func.func @transform_0(%arg0: i32) -> (i32, i32) {
    %c0_i32 = arith.constant 0 : i32
    %c0_i32_0 = arith.constant 0 : i32
    %c0_i32_1 = arith.constant 0 : i32
    return %c0_i32, %c0_i32_0 : i32, i32
  }
  func.func @transform_1(%arg0: i32) -> (i32, i32) {
    %c0_i32 = arith.constant 0 : i32
    %c0_i32_0 = arith.constant 0 : i32
    %c0_i32_1 = arith.constant 0 : i32
    return %c0_i32, %c0_i32_0 : i32, i32
  }
  func.func @transform_2(%arg0: i32) -> (i32, i32) {
    %c0_i32 = arith.constant 0 : i32
    %c0_i32_0 = arith.constant 0 : i32
    %c0_i32_1 = arith.constant 0 : i32
    return %c0_i32, %c0_i32_0 : i32, i32
  }
}

</mosaic_0001>

<bundles_post_ra>
// kernel: embedding_classifier.1
= control target key start
LH: loop header
LB: loop body
LE: loop exit
PB: predicated region body
PF: predicated region fallthrough
CT: control target
= control target key end

     0   :  { %7 = vsyncpa [#allocation3], 0  ;;  %s368_s0 = inlined_call_operand.hbm [shape: f32[8,32], index: 0, kind: input, shape index: {}]   ;;  %s369_s1 = inlined_call_operand.hbm [shape: bf16[176,128], index: 1, kind: input, shape index: {}]   ;;  %s370_s2 = inlined_call_operand.hbm [shape: f32[8,128], index: 2, kind: output, shape index: {}]  }
   0x1   :  { %8 = vsyncpa [#allocation6], 0 }
   0x2   :  { %9 = vsyncpa [#allocation4], 0  ;;  %s15_s11 = sshll.u32 %s368_s0, 4  ;;  %s339_s12 = smov [#allocation2]   ;;  %s16_s11 = int_to_ptr.hbm [resolvable:$true] %s15_s11 }
   0x3   :  { %s17_s13 = sshll.u32 %s339_s12, 4  ;;  %s25_s16 = sshll.u32 %s369_s1, 4  ;;  %s18_s13 = int_to_ptr.vmem [resolvable:$true] %s17_s13  ;;  %s26_s16 = int_to_ptr.hbm [resolvable:$true] %s25_s16 }
   0x4   :  { %20 = dma.hbm_to_vmem [thread:$0]  %s16_s11, 128, %s18_s13, [#allocation3]  }
   0x5   :  { %s340_s17 = smov [#allocation5]   ;;  %s341_s19 = smov 64  }
   0x6   :  { %s27_s18 = sshll.u32 %s340_s17, 4  ;;  %s342_s20 = smov 4   ;;  %s28_s18 = int_to_ptr.vmem [resolvable:$true] %s27_s18 }
   0x7   :  { %33 = dma.hbm_to_vmem [thread:$0]  %s26_s16, 1408, %s28_s18, [#allocation6], %s341_s19, %s341_s19, %s342_s20  }
   0x8   :  { %333 = dma.done.wait [#allocation3], 128  }
   0x9   :  { %334 = vsyncadd [#allocation3], 4294967168 }
   0xa   :  { %335 = dma.done.wait [#allocation6], 1408  }
   0xb   :  { %336 = vsyncadd [#allocation6], 4294965888  ;;  %v247_v0 = vld [vmem:[#allocation5 + $0x8] sm:$0xff]  ;;  %v246_v2 = vld [vmem:[#allocation5] sm:$0xff]  ;;  %vm80_vm0 = vcmask 261120   ;;  %vm124_vm1 = vcmask 523264  }
   0xc   :  { %v251_v1 = vld [vmem:[#allocation5 + $0x28] sm:$0xff]  ;;  %90 = vmatpush.bf16.msra.mxu0 %v247_v0  ;;  %v43_v3 = vld [vmem:[#allocation2] sm:$0xff]  ;;  %v250_v4 = vld [vmem:[#allocation5 + $0x20] sm:$0xff]  ;;  %s343_s0 = smov [#allocation7]   ;;  %s192_s23 = sshll.u32 %s370_s2, 4  ;;  %s193_s23 = int_to_ptr.hbm [resolvable:$true] %s192_s23 }
   0xd   :  { %132 = vmatpush.bf16.msra.mxu1 %v251_v1  ;;  %v44_v5 = vpack.c.bf16 %v43_v3, %v43_v3  ;;  %v249_v6 = vld [vmem:[#allocation5 + $0x18] sm:$0xff]  ;;  %v248_v7 = vld [vmem:[#allocation5 + $0x10] sm:$0xff]  ;;  %v255_v8 = vld [vmem:[#allocation5 + $0x48] sm:$0xff]  ;;  %s190_s1 = sshll.u32 %s343_s0, 4  ;;  %s191_s1 = int_to_ptr.vmem [resolvable:$true] %s190_s1 }
   0xe   :  { %175 = vmatpush.bf16.msra.mxu2 %v255_v8  ;;  %v254_v9 = vld [vmem:[#allocation5 + $0x40] sm:$0xff]  ;;  %v65_v10 = vld [vmem:[#allocation5 + $0x50] sm:$0x3]  ;;  %v253_v18 = vld [vmem:[#allocation5 + $0x38] sm:$0xff] }
   0xf   :  { %v66_v11 = vunpack.c.l.bf16 %v65_v10  ;;  %v252_v19 = vld [vmem:[#allocation5 + $0x30] sm:$0xff] }
  0x10   :  { %91 = vmatpush.bf16.msra.mxu0 %v246_v2 }
  0x11   :  { %133 = vmatpush.bf16.msra.mxu1 %v250_v4  ;;  %v67_v12 = vperm.slane %v66_v11, 0  ;;  %v99_v20 = vperm.slane %v66_v11, 1  ;;  %v143_v26 = vperm.slane %v66_v11, 2 }
  0x12   :  { %176 = vmatpush.bf16.msra.mxu2 %v254_v9 }
  0x13   :  { %211 = vmatmul.msk.bf16.vlgmr.msra.gmra.mxu0 %vm80_vm0, %v44_v5 }
  0x15   :  { %134 = vmatpush.bf16.msra.mxu1 %v249_v6 }
  0x16   :  { %177 = vmatpush.bf16.msra.mxu2 %v253_v18 }
  0x19   :  { %135 = vmatpush.bf16.msra.mxu1 %v248_v7 }
  0x1a   :  { %178 = vmatpush.bf16.msra.mxu2 %v252_v19 }
  0x90   :  { %v93_v13 = vpop.f32.mrf.mxu0 }
  0x91   :  { %v94_v14 = vadd.f32 %v93_v13, %v67_v12 }
  0x93   :  { %v97_v15 = vmax.f32 %v94_v14, 0.0 }
  0x95   :  { %v98_v16 = vpack.c.bf16 %v97_v15, %v97_v15 }
  0x97   :  { %228 = vmatmul.msk.bf16.vlgmr.msra.gmra.mxu1 %vm124_vm1, %v98_v16 }
  0x98   :  { %v95_v17 = vpop.f32.mrf.mxu0 }
 0x114   :  { %v137_v21 = vpop.f32.mrf.mxu1 }
 0x115   :  { %v138_v22 = vadd.f32 %v137_v21, %v99_v20 }
 0x117   :  { %v141_v23 = vmax.f32 %v138_v22, 0.0 }
 0x119   :  { %v142_v24 = vpack.c.bf16 %v141_v23, %v141_v23 }
 0x11b   :  { %245 = vmatmul.msk.bf16.vlgmr.msra.gmra.mxu2 %vm124_vm1, %v142_v24 }
 0x11c   :  { %v139_v25 = vpop.f32.mrf.mxu1 }
 0x19e   :  { %v180_v27 = vpop.f32.mrf.mxu2 }
 0x19f   :  { %v181_v28 = vadd.f32 %v180_v27, %v143_v26 }
 0x1a1   :  { %184 = vst [vmem:[#allocation7] sm:$0xff] %v181_v28 }
 0x1a2   :  { %195 = dma.vmem_to_hbm [thread:$0]  %s191_s1, 128, %s193_s23, [#allocation4]  }
 0x1a6   :  { %v182_v29 = vpop.f32.mrf.mxu2 }
 0x1a7   :  { %337 = dma.done.wait [#allocation4], 128  }
 0x1a8   :  { %338 = vsyncadd [#allocation4], 4294967168 }
 0x1a9   :  { %200 = vsyncpa [#allocation3], 1 }
 0x1aa   :  { %201 = vsyncpa [#allocation6], 1 }
 0x1ab   :  { %202 = vsyncpa [#allocation4], 1 }

</bundles_post_ra>
